<compile_context>
chip_gen: v7x
topology: tpu7x:2x2x1
jax: 0.10.0
libtpu: 0.0.40
codegen_flags: <defaults>
</compile_context>

<pallas_src>
import functools

import numpy as np
import jax
import jax.numpy as jnp
from jax import lax
from jax.experimental import pallas as pl
from jax.experimental.pallas import tpu as pltpu


def _lip_swish(x):
    return x * jax.nn.sigmoid(x) * (1.0 / 1.1)


def _lane_shift(x, d, L):
    """y[..., i] = x[..., (i + d) % L] for a static shift d (wrap is masked by caller)."""
    d = d % L
    if d == 0:
        return x
    return jnp.concatenate([x[..., d:], x[..., :d]], axis=-1)


def _resblock_kernel(x_ref, m_ref, w1_ref, b1_ref, w2_ref, b2_ref, *rest,
                     has_skip, downsample, H, W):
    rest = list(rest)
    wskip_ref = rest.pop(0) if has_skip else None
    pw_ref = rest.pop(0) if downsample else None
    o_ref = rest.pop(0)

    L = H * W
    x = x_ref[0]            # (Cin, L)  lane-dense image
    masks = m_ref[...]      # (9, L)    0/1 boundary masks (one per 3x3 tap)

    def im2col(a):
        # a: (C, L) -> (9*C, L); row order (ky, kx, c) matches w.reshape(9*C, Cout).
        taps = []
        for ky in range(3):
            for kx in range(3):
                d = (ky - 1) * W + (kx - 1)
                t = 3 * ky + kx
                s = _lane_shift(a, d, L)
                if d != 0:
                    s = s * masks[t:t + 1, :]
                taps.append(s)
        return jnp.concatenate(taps, axis=0)

    # ---- conv1: 3x3, padding=1, bias; then Lip_swish ----
    h = jnp.dot(w1_ref[...], im2col(x), preferred_element_type=jnp.float32)
    h = _lip_swish(h + b1_ref[...])

    # ---- conv2: 3x3, padding=1, bias ----
    out = jnp.dot(w2_ref[...], im2col(h), preferred_element_type=jnp.float32)
    out = out + b2_ref[...]

    # ---- skip path (1x1 conv, no bias); identity skip requires Cin == Cout ----
    if has_skip:
        out = out + jnp.dot(wskip_ref[...], x, preferred_element_type=jnp.float32)
    else:
        out = out + x

    # ---- optional 2x2 average pool ----
    # For each output row: add the two contributing input rows (static lane
    # slices) and average/compact adjacent column pairs with a tiny (W, W//2)
    # matrix carrying the full 0.25 factor.
    if downsample:
        Ho = H // 2
        rows = []
        for ho in range(Ho):
            a = out[:, (2 * ho) * W:(2 * ho + 1) * W]
            b = out[:, (2 * ho + 1) * W:(2 * ho + 2) * W]
            rows.append(jnp.dot(a + b, pw_ref[...],
                                preferred_element_type=jnp.float32))
        out = jnp.concatenate(rows, axis=1)          # (Cout, Ho*Wo)

    out = _lip_swish(out)
    o_ref[0] = out.astype(o_ref.dtype)


def _make_tap_masks(H, W):
    """(9, H*W) 0/1 masks: validity of each 3x3 tap offset under 'same' padding."""
    y, x = np.mgrid[0:H, 0:W]
    rows = []
    for dy in (-1, 0, 1):
        for dx in (-1, 0, 1):
            valid = ((y + dy >= 0) & (y + dy < H) &
                     (x + dx >= 0) & (x + dx < W))
            rows.append(valid.reshape(-1).astype(np.float32))
    return jnp.asarray(np.stack(rows))


def _make_width_pool_matrix(W):
    """(W, W//2) matrix: averages adjacent column pairs with weight 0.25 each."""
    Wo = W // 2
    P = np.zeros((W, Wo), np.float32)
    P[2 * np.arange(Wo), np.arange(Wo)] = 0.25
    P[2 * np.arange(Wo) + 1, np.arange(Wo)] = 0.25
    return jnp.asarray(P)


def resblock_forward(x_nchw, w1, b1, w2, b2, wskip, *, downsample):
    """ResBlock forward. x_nchw: (N, Cin, H, W) f32. Returns NCHW f32."""
    N, Cin, H, W = x_nchw.shape
    Cout = w1.shape[-1]
    has_skip = wskip is not None
    Ho, Wo = (H // 2, W // 2) if downsample else (H, W)
    L, Lo = H * W, Ho * Wo

    x = x_nchw.reshape(N, Cin, L)            # free view; stays NCHW
    w1t = w1.reshape(9 * Cin, Cout).T        # (Cout, 9*Cin), (ky,kx,cin) flat order
    w2t = w2.reshape(9 * Cout, Cout).T       # (Cout, 9*Cout)
    b1c = b1.reshape(Cout, 1)
    b2c = b2.reshape(Cout, 1)

    inputs = [x, _make_tap_masks(H, W), w1t, b1c, w2t, b2c]
    in_specs = [
        pl.BlockSpec((1, Cin, L), lambda n: (n, 0, 0)),
        pl.BlockSpec((9, L), lambda n: (0, 0)),
        pl.BlockSpec((Cout, 9 * Cin), lambda n: (0, 0)),
        pl.BlockSpec((Cout, 1), lambda n: (0, 0)),
        pl.BlockSpec((Cout, 9 * Cout), lambda n: (0, 0)),
        pl.BlockSpec((Cout, 1), lambda n: (0, 0)),
    ]
    if has_skip:
        inputs.append(wskip.T)               # (Cout, Cin)
        in_specs.append(pl.BlockSpec((Cout, Cin), lambda n: (0, 0)))
    if downsample:
        inputs.append(_make_width_pool_matrix(W))   # (W, Wo)
        in_specs.append(pl.BlockSpec((W, Wo), lambda n: (0, 0)))

    kernel = functools.partial(_resblock_kernel, has_skip=has_skip,
                               downsample=downsample, H=H, W=W)

    out = pl.pallas_call(
        kernel,
        grid=(N,),
        in_specs=in_specs,
        out_specs=pl.BlockSpec((1, Cout, Lo), lambda n: (n, 0, 0)),
        out_shape=jax.ShapeDtypeStruct((N, Cout, Lo), jnp.float32),
        compiler_params=pltpu.CompilerParams(
            dimension_semantics=("parallel",)),
    )(*inputs)

    return out.reshape(N, Cout, Ho, Wo)      # free view; NCHW output


def resblock_reference(x_nchw, w1, b1, w2, b2, wskip, *, downsample):
    """Pure-JAX reference (matches the PyTorch forward semantics)."""
    def conv(x, w, b):
        y = lax.conv_general_dilated(
            x, w, (1, 1), 'SAME',
            dimension_numbers=('NHWC', 'HWIO', 'NHWC'))
        return y if b is None else y + b

    x = jnp.transpose(x_nchw, (0, 2, 3, 1))
    out = conv(x, w1, b1)
    out = out * jax.nn.sigmoid(out) / 1.1
    out = conv(out, w2, b2)
    if wskip is not None:
        skip = conv(x, wskip.reshape(1, 1, *wskip.shape), None)
    else:
        skip = x
    out = out + skip
    if downsample:
        out = lax.reduce_window(out, 0.0, lax.add,
                                (1, 2, 2, 1), (1, 2, 2, 1), 'VALID') / 4.0
    out = out * jax.nn.sigmoid(out) / 1.1
    return jnp.transpose(out, (0, 3, 1, 2))


if __name__ == "__main__":
    # Config: ResBlock(in_channel=4, out_channel=8, downsample=True)
    # (in != out and downsample=True => skip 1x1 conv present, avg_pool2d(2) applied)
    N, Cin, Cout, H, W = 2, 4, 8, 16, 16
    downsample = True

    key = jax.random.PRNGKey(0)
    ks = jax.random.split(key, 6)
    # Deterministic synthetic parameters (no checkpoint load).
    # TODO(synk): Conv2D's data-dependent init ("data_init") is an init-time
    # reparameterization; forward math is a plain conv, so plain init is used.
    x = jax.random.normal(ks[0], (N, Cin, H, W), jnp.float32)
    w1 = jax.random.normal(ks[1], (3, 3, Cin, Cout), jnp.float32) * 0.1
    b1 = jax.random.normal(ks[2], (Cout,), jnp.float32) * 0.1
    w2 = jax.random.normal(ks[3], (3, 3, Cout, Cout), jnp.float32) * 0.1
    b2 = jax.random.normal(ks[4], (Cout,), jnp.float32) * 0.1
    wskip = jax.random.normal(ks[5], (Cin, Cout), jnp.float32) * 0.1

    out = resblock_forward(x, w1, b1, w2, b2, wskip, downsample=downsample)
    out = jax.block_until_ready(out)

    ref = resblock_reference(x, w1, b1, w2, b2, wskip, downsample=downsample)
    assert out.shape == (N, Cout, H // 2, W // 2), out.shape
    np.testing.assert_allclose(np.asarray(out), np.asarray(ref),
                               rtol=1e-4, atol=1e-4)
    print("KERNEL_OK")
</pallas_src>

<mosaic_0001>
module attributes {stable_mosaic.version = 11 : i64} {
  func.func @_resblock_kernel(%arg0: i32, %arg1: memref<1x4x256xf32, #tpu.memory_space<vmem>>, %arg2: memref<9x256xf32, #tpu.memory_space<vmem>>, %arg3: memref<8x36xf32, #tpu.memory_space<vmem>>, %arg4: memref<8x1xf32, #tpu.memory_space<vmem>>, %arg5: memref<8x72xf32, #tpu.memory_space<vmem>>, %arg6: memref<8x1xf32, #tpu.memory_space<vmem>>, %arg7: memref<8x4xf32, #tpu.memory_space<vmem>>, %arg8: memref<16x8xf32, #tpu.memory_space<vmem>>, %arg9: memref<1x8x64xf32, #tpu.memory_space<vmem>>) attributes {dimension_semantics = [#tpu.dimension_semantics<parallel>], iteration_bounds = array<i64: 2>, scalar_prefetch = 0 : i64, scratch_operands = 0 : i64, tpu.core_type = #tpu.core_type<tc>, window_params = [{transform_indices = @transform_0, window_bounds = array<i64: 1, 4, 256>}, {pipeline_mode = #tpu.pipeline_mode<synchronous>, transform_indices = @transform_1, window_bounds = array<i64: 9, 256>}, {pipeline_mode = #tpu.pipeline_mode<synchronous>, transform_indices = @transform_2, window_bounds = array<i64: 8, 36>}, {pipeline_mode = #tpu.pipeline_mode<synchronous>, transform_indices = @transform_3, window_bounds = array<i64: 8, 1>}, {pipeline_mode = #tpu.pipeline_mode<synchronous>, transform_indices = @transform_4, window_bounds = array<i64: 8, 72>}, {pipeline_mode = #tpu.pipeline_mode<synchronous>, transform_indices = @transform_5, window_bounds = array<i64: 8, 1>}, {pipeline_mode = #tpu.pipeline_mode<synchronous>, transform_indices = @transform_6, window_bounds = array<i64: 8, 4>}, {pipeline_mode = #tpu.pipeline_mode<synchronous>, transform_indices = @transform_7, window_bounds = array<i64: 16, 8>}, {transform_indices = @transform_8, window_bounds = array<i64: 1, 8, 64>}]} {
    %c0 = arith.constant 0 : index
    %c0_0 = arith.constant 0 : index
    %c0_1 = arith.constant 0 : index
    %0 = vector.load %arg1[%c0, %c0_0, %c0_1] : memref<1x4x256xf32, #tpu.memory_space<vmem>>, vector<1x4x256xf32>
    %1 = vector.shape_cast %0 : vector<1x4x256xf32> to vector<4x256xf32>
    %c0_2 = arith.constant 0 : index
    %c0_3 = arith.constant 0 : index
    %2 = vector.load %arg2[%c0_2, %c0_3] : memref<9x256xf32, #tpu.memory_space<vmem>>, vector<9x256xf32>
    %c0_4 = arith.constant 0 : index
    %c0_5 = arith.constant 0 : index
    %3 = vector.load %arg3[%c0_4, %c0_5] : memref<8x36xf32, #tpu.memory_space<vmem>>, vector<8x36xf32>
    %4 = vector.extract_strided_slice %1 {offsets = [0, 239], sizes = [4, 17], strides = [1, 1]} : vector<4x256xf32> to vector<4x17xf32>
    %5 = vector.extract_strided_slice %1 {offsets = [0, 0], sizes = [4, 239], strides = [1, 1]} : vector<4x256xf32> to vector<4x239xf32>
    %6 = tpu.concatenate %4, %5 in 1 : vector<4x17xf32>, vector<4x239xf32> -> vector<4x256xf32>
    %7 = vector.extract_strided_slice %2 {offsets = [0, 0], sizes = [1, 256], strides = [1, 1]} : vector<9x256xf32> to vector<1x256xf32>
    %8 = vector.broadcast %7 : vector<1x256xf32> to vector<4x256xf32>
    %9 = arith.mulf %6, %8 : vector<4x256xf32>
    %10 = vector.extract_strided_slice %1 {offsets = [0, 240], sizes = [4, 16], strides = [1, 1]} : vector<4x256xf32> to vector<4x16xf32>
    %11 = vector.extract_strided_slice %1 {offsets = [0, 0], sizes = [4, 240], strides = [1, 1]} : vector<4x256xf32> to vector<4x240xf32>
    %12 = tpu.concatenate %10, %11 in 1 : vector<4x16xf32>, vector<4x240xf32> -> vector<4x256xf32>
    %13 = vector.extract_strided_slice %2 {offsets = [1, 0], sizes = [1, 256], strides = [1, 1]} : vector<9x256xf32> to vector<1x256xf32>
    %14 = vector.broadcast %13 : vector<1x256xf32> to vector<4x256xf32>
    %15 = arith.mulf %12, %14 : vector<4x256xf32>
    %16 = vector.extract_strided_slice %1 {offsets = [0, 241], sizes = [4, 15], strides = [1, 1]} : vector<4x256xf32> to vector<4x15xf32>
    %17 = vector.extract_strided_slice %1 {offsets = [0, 0], sizes = [4, 241], strides = [1, 1]} : vector<4x256xf32> to vector<4x241xf32>
    %18 = tpu.concatenate %16, %17 in 1 : vector<4x15xf32>, vector<4x241xf32> -> vector<4x256xf32>
    %19 = vector.extract_strided_slice %2 {offsets = [2, 0], sizes = [1, 256], strides = [1, 1]} : vector<9x256xf32> to vector<1x256xf32>
    %20 = vector.broadcast %19 : vector<1x256xf32> to vector<4x256xf32>
    %21 = arith.mulf %18, %20 : vector<4x256xf32>
    %22 = vector.extract_strided_slice %1 {offsets = [0, 255], sizes = [4, 1], strides = [1, 1]} : vector<4x256xf32> to vector<4x1xf32>
    %23 = vector.extract_strided_slice %1 {offsets = [0, 0], sizes = [4, 255], strides = [1, 1]} : vector<4x256xf32> to vector<4x255xf32>
    %24 = tpu.concatenate %22, %23 in 1 : vector<4x1xf32>, vector<4x255xf32> -> vector<4x256xf32>
    %25 = vector.extract_strided_slice %2 {offsets = [3, 0], sizes = [1, 256], strides = [1, 1]} : vector<9x256xf32> to vector<1x256xf32>
    %26 = vector.broadcast %25 : vector<1x256xf32> to vector<4x256xf32>
    %27 = arith.mulf %24, %26 : vector<4x256xf32>
    %28 = vector.extract_strided_slice %1 {offsets = [0, 1], sizes = [4, 255], strides = [1, 1]} : vector<4x256xf32> to vector<4x255xf32>
    %29 = vector.extract_strided_slice %1 {offsets = [0, 0], sizes = [4, 1], strides = [1, 1]} : vector<4x256xf32> to vector<4x1xf32>
    %30 = tpu.concatenate %28, %29 in 1 : vector<4x255xf32>, vector<4x1xf32> -> vector<4x256xf32>
    %31 = vector.extract_strided_slice %2 {offsets = [5, 0], sizes = [1, 256], strides = [1, 1]} : vector<9x256xf32> to vector<1x256xf32>
    %32 = vector.broadcast %31 : vector<1x256xf32> to vector<4x256xf32>
    %33 = arith.mulf %30, %32 : vector<4x256xf32>
    %34 = vector.extract_strided_slice %1 {offsets = [0, 15], sizes = [4, 241], strides = [1, 1]} : vector<4x256xf32> to vector<4x241xf32>
    %35 = vector.extract_strided_slice %1 {offsets = [0, 0], sizes = [4, 15], strides = [1, 1]} : vector<4x256xf32> to vector<4x15xf32>
    %36 = tpu.concatenate %34, %35 in 1 : vector<4x241xf32>, vector<4x15xf32> -> vector<4x256xf32>
    %37 = vector.extract_strided_slice %2 {offsets = [6, 0], sizes = [1, 256], strides = [1, 1]} : vector<9x256xf32> to vector<1x256xf32>
    %38 = vector.broadcast %37 : vector<1x256xf32> to vector<4x256xf32>
    %39 = arith.mulf %36, %38 : vector<4x256xf32>
    %40 = vector.extract_strided_slice %1 {offsets = [0, 16], sizes = [4, 240], strides = [1, 1]} : vector<4x256xf32> to vector<4x240xf32>
    %41 = vector.extract_strided_slice %1 {offsets = [0, 0], sizes = [4, 16], strides = [1, 1]} : vector<4x256xf32> to vector<4x16xf32>
    %42 = tpu.concatenate %40, %41 in 1 : vector<4x240xf32>, vector<4x16xf32> -> vector<4x256xf32>
    %43 = vector.extract_strided_slice %2 {offsets = [7, 0], sizes = [1, 256], strides = [1, 1]} : vector<9x256xf32> to vector<1x256xf32>
    %44 = vector.broadcast %43 : vector<1x256xf32> to vector<4x256xf32>
    %45 = arith.mulf %42, %44 : vector<4x256xf32>
    %46 = vector.extract_strided_slice %1 {offsets = [0, 17], sizes = [4, 239], strides = [1, 1]} : vector<4x256xf32> to vector<4x239xf32>
    %47 = vector.extract_strided_slice %1 {offsets = [0, 0], sizes = [4, 17], strides = [1, 1]} : vector<4x256xf32> to vector<4x17xf32>
    %48 = tpu.concatenate %46, %47 in 1 : vector<4x239xf32>, vector<4x17xf32> -> vector<4x256xf32>
    %49 = vector.extract_strided_slice %2 {offsets = [8, 0], sizes = [1, 256], strides = [1, 1]} : vector<9x256xf32> to vector<1x256xf32>
    %50 = vector.broadcast %49 : vector<1x256xf32> to vector<4x256xf32>
    %51 = arith.mulf %48, %50 : vector<4x256xf32>
    %52 = tpu.concatenate %9, %15, %21, %27, %1, %33, %39, %45, %51 in 0 : vector<4x256xf32>, vector<4x256xf32>, vector<4x256xf32>, vector<4x256xf32>, vector<4x256xf32>, vector<4x256xf32>, vector<4x256xf32>, vector<4x256xf32>, vector<4x256xf32> -> vector<36x256xf32>
    %cst = arith.constant dense<0.000000e+00> : vector<8x256xf32>
    %53 = tpu.matmul %3, %52, %cst {dimension_numbers = #tpu.dot_dimension_numbers<[1], [0], [0], [1], [0, 0, 1, 1], [], []>} : vector<8x36xf32>, vector<36x256xf32>, vector<8x256xf32> -> vector<8x256xf32>
    %c0_6 = arith.constant 0 : index
    %c0_7 = arith.constant 0 : index
    %54 = vector.load %arg4[%c0_6, %c0_7] : memref<8x1xf32, #tpu.memory_space<vmem>>, vector<8x1xf32>
    %55 = vector.broadcast %54 : vector<8x1xf32> to vector<8x256xf32>
    %56 = arith.addf %53, %55 : vector<8x256xf32>
    %57 = arith.negf %56 : vector<8x256xf32>
    %58 = math.exp %57 : vector<8x256xf32>
    %cst_8 = arith.constant 1.000000e+00 : f32
    %59 = vector.broadcast %cst_8 : f32 to vector<8x256xf32>
    %60 = arith.addf %59, %58 : vector<8x256xf32>
    %61 = arith.divf %59, %60 : vector<8x256xf32>
    %62 = arith.mulf %56, %61 : vector<8x256xf32>
    %cst_9 = arith.constant 0.909090936 : f32
    %63 = vector.broadcast %cst_9 : f32 to vector<8x256xf32>
    %64 = arith.mulf %62, %63 : vector<8x256xf32>
    %c0_10 = arith.constant 0 : index
    %c0_11 = arith.constant 0 : index
    %65 = vector.load %arg5[%c0_10, %c0_11] : memref<8x72xf32, #tpu.memory_space<vmem>>, vector<8x72xf32>
    %66 = vector.extract_strided_slice %64 {offsets = [0, 239], sizes = [8, 17], strides = [1, 1]} : vector<8x256xf32> to vector<8x17xf32>
    %67 = vector.extract_strided_slice %64 {offsets = [0, 0], sizes = [8, 239], strides = [1, 1]} : vector<8x256xf32> to vector<8x239xf32>
    %68 = tpu.concatenate %66, %67 in 1 : vector<8x17xf32>, vector<8x239xf32> -> vector<8x256xf32>
    %69 = vector.extract_strided_slice %2 {offsets = [0, 0], sizes = [1, 256], strides = [1, 1]} : vector<9x256xf32> to vector<1x256xf32>
    %70 = vector.broadcast %69 : vector<1x256xf32> to vector<8x256xf32>
    %71 = arith.mulf %68, %70 : vector<8x256xf32>
    %72 = vector.extract_strided_slice %64 {offsets = [0, 240], sizes = [8, 16], strides = [1, 1]} : vector<8x256xf32> to vector<8x16xf32>
    %73 = vector.extract_strided_slice %64 {offsets = [0, 0], sizes = [8, 240], strides = [1, 1]} : vector<8x256xf32> to vector<8x240xf32>
    %74 = tpu.concatenate %72, %73 in 1 : vector<8x16xf32>, vector<8x240xf32> -> vector<8x256xf32>
    %75 = vector.extract_strided_slice %2 {offsets = [1, 0], sizes = [1, 256], strides = [1, 1]} : vector<9x256xf32> to vector<1x256xf32>
    %76 = vector.broadcast %75 : vector<1x256xf32> to vector<8x256xf32>
    %77 = arith.mulf %74, %76 : vector<8x256xf32>
    %78 = vector.extract_strided_slice %64 {offsets = [0, 241], sizes = [8, 15], strides = [1, 1]} : vector<8x256xf32> to vector<8x15xf32>
    %79 = vector.extract_strided_slice %64 {offsets = [0, 0], sizes = [8, 241], strides = [1, 1]} : vector<8x256xf32> to vector<8x241xf32>
    %80 = tpu.concatenate %78, %79 in 1 : vector<8x15xf32>, vector<8x241xf32> -> vector<8x256xf32>
    %81 = vector.extract_strided_slice %2 {offsets = [2, 0], sizes = [1, 256], strides = [1, 1]} : vector<9x256xf32> to vector<1x256xf32>
    %82 = vector.broadcast %81 : vector<1x256xf32> to vector<8x256xf32>
    %83 = arith.mulf %80, %82 : vector<8x256xf32>
    %84 = vector.extract_strided_slice %64 {offsets = [0, 255], sizes = [8, 1], strides = [1, 1]} : vector<8x256xf32> to vector<8x1xf32>
    %85 = vector.extract_strided_slice %64 {offsets = [0, 0], sizes = [8, 255], strides = [1, 1]} : vector<8x256xf32> to vector<8x255xf32>
    %86 = tpu.concatenate %84, %85 in 1 : vector<8x1xf32>, vector<8x255xf32> -> vector<8x256xf32>
    %87 = vector.extract_strided_slice %2 {offsets = [3, 0], sizes = [1, 256], strides = [1, 1]} : vector<9x256xf32> to vector<1x256xf32>
    %88 = vector.broadcast %87 : vector<1x256xf32> to vector<8x256xf32>
    %89 = arith.mulf %86, %88 : vector<8x256xf32>
    %90 = vector.extract_strided_slice %64 {offsets = [0, 1], sizes = [8, 255], strides = [1, 1]} : vector<8x256xf32> to vector<8x255xf32>
    %91 = vector.extract_strided_slice %64 {offsets = [0, 0], sizes = [8, 1], strides = [1, 1]} : vector<8x256xf32> to vector<8x1xf32>
    %92 = tpu.concatenate %90, %91 in 1 : vector<8x255xf32>, vector<8x1xf32> -> vector<8x256xf32>
    %93 = vector.extract_strided_slice %2 {offsets = [5, 0], sizes = [1, 256], strides = [1, 1]} : vector<9x256xf32> to vector<1x256xf32>
    %94 = vector.broadcast %93 : vector<1x256xf32> to vector<8x256xf32>
    %95 = arith.mulf %92, %94 : vector<8x256xf32>
    %96 = vector.extract_strided_slice %64 {offsets = [0, 15], sizes = [8, 241], strides = [1, 1]} : vector<8x256xf32> to vector<8x241xf32>
    %97 = vector.extract_strided_slice %64 {offsets = [0, 0], sizes = [8, 15], strides = [1, 1]} : vector<8x256xf32> to vector<8x15xf32>
    %98 = tpu.concatenate %96, %97 in 1 : vector<8x241xf32>, vector<8x15xf32> -> vector<8x256xf32>
    %99 = vector.extract_strided_slice %2 {offsets = [6, 0], sizes = [1, 256], strides = [1, 1]} : vector<9x256xf32> to vector<1x256xf32>
    %100 = vector.broadcast %99 : vector<1x256xf32> to vector<8x256xf32>
    %101 = arith.mulf %98, %100 : vector<8x256xf32>
    %102 = vector.extract_strided_slice %64 {offsets = [0, 16], sizes = [8, 240], strides = [1, 1]} : vector<8x256xf32> to vector<8x240xf32>
    %103 = vector.extract_strided_slice %64 {offsets = [0, 0], sizes = [8, 16], strides = [1, 1]} : vector<8x256xf32> to vector<8x16xf32>
    %104 = tpu.concatenate %102, %103 in 1 : vector<8x240xf32>, vector<8x16xf32> -> vector<8x256xf32>
    %105 = vector.extract_strided_slice %2 {offsets = [7, 0], sizes = [1, 256], strides = [1, 1]} : vector<9x256xf32> to vector<1x256xf32>
    %106 = vector.broadcast %105 : vector<1x256xf32> to vector<8x256xf32>
    %107 = arith.mulf %104, %106 : vector<8x256xf32>
    %108 = vector.extract_strided_slice %64 {offsets = [0, 17], sizes = [8, 239], strides = [1, 1]} : vector<8x256xf32> to vector<8x239xf32>
    %109 = vector.extract_strided_slice %64 {offsets = [0, 0], sizes = [8, 17], strides = [1, 1]} : vector<8x256xf32> to vector<8x17xf32>
    %110 = tpu.concatenate %108, %109 in 1 : vector<8x239xf32>, vector<8x17xf32> -> vector<8x256xf32>
    %111 = vector.extract_strided_slice %2 {offsets = [8, 0], sizes = [1, 256], strides = [1, 1]} : vector<9x256xf32> to vector<1x256xf32>
    %112 = vector.broadcast %111 : vector<1x256xf32> to vector<8x256xf32>
    %113 = arith.mulf %110, %112 : vector<8x256xf32>
    %114 = tpu.concatenate %71, %77, %83, %89, %64, %95, %101, %107, %113 in 0 : vector<8x256xf32>, vector<8x256xf32>, vector<8x256xf32>, vector<8x256xf32>, vector<8x256xf32>, vector<8x256xf32>, vector<8x256xf32>, vector<8x256xf32>, vector<8x256xf32> -> vector<72x256xf32>
    %cst_12 = arith.constant dense<0.000000e+00> : vector<8x256xf32>
    %115 = tpu.matmul %65, %114, %cst_12 {dimension_numbers = #tpu.dot_dimension_numbers<[1], [0], [0], [1], [0, 0, 1, 1], [], []>} : vector<8x72xf32>, vector<72x256xf32>, vector<8x256xf32> -> vector<8x256xf32>
    %c0_13 = arith.constant 0 : index
    %c0_14 = arith.constant 0 : index
    %116 = vector.load %arg6[%c0_13, %c0_14] : memref<8x1xf32, #tpu.memory_space<vmem>>, vector<8x1xf32>
    %117 = vector.broadcast %116 : vector<8x1xf32> to vector<8x256xf32>
    %118 = arith.addf %115, %117 : vector<8x256xf32>
    %c0_15 = arith.constant 0 : index
    %c0_16 = arith.constant 0 : index
    %119 = vector.load %arg7[%c0_15, %c0_16] : memref<8x4xf32, #tpu.memory_space<vmem>>, vector<8x4xf32>
    %cst_17 = arith.constant dense<0.000000e+00> : vector<8x256xf32>
    %120 = tpu.matmul %119, %1, %cst_17 {dimension_numbers = #tpu.dot_dimension_numbers<[1], [0], [0], [1], [0, 0, 1, 1], [], []>} : vector<8x4xf32>, vector<4x256xf32>, vector<8x256xf32> -> vector<8x256xf32>
    %121 = arith.addf %118, %120 : vector<8x256xf32>
    %122 = vector.extract_strided_slice %121 {offsets = [0, 0], sizes = [8, 16], strides = [1, 1]} : vector<8x256xf32> to vector<8x16xf32>
    %123 = vector.extract_strided_slice %121 {offsets = [0, 16], sizes = [8, 16], strides = [1, 1]} : vector<8x256xf32> to vector<8x16xf32>
    %124 = arith.addf %122, %123 : vector<8x16xf32>
    %c0_18 = arith.constant 0 : index
    %c0_19 = arith.constant 0 : index
    %125 = vector.load %arg8[%c0_18, %c0_19] : memref<16x8xf32, #tpu.memory_space<vmem>>, vector<16x8xf32>
    %cst_20 = arith.constant dense<0.000000e+00> : vector<8x8xf32>
    %126 = tpu.matmul %124, %125, %cst_20 {dimension_numbers = #tpu.dot_dimension_numbers<[1], [0], [0], [1], [0, 0, 1, 1], [], []>} : vector<8x16xf32>, vector<16x8xf32>, vector<8x8xf32> -> vector<8x8xf32>
    %127 = vector.extract_strided_slice %121 {offsets = [0, 32], sizes = [8, 16], strides = [1, 1]} : vector<8x256xf32> to vector<8x16xf32>
    %128 = vector.extract_strided_slice %121 {offsets = [0, 48], sizes = [8, 16], strides = [1, 1]} : vector<8x256xf32> to vector<8x16xf32>
    %129 = arith.addf %127, %128 : vector<8x16xf32>
    %c0_21 = arith.constant 0 : index
    %c0_22 = arith.constant 0 : index
    %130 = vector.load %arg8[%c0_21, %c0_22] : memref<16x8xf32, #tpu.memory_space<vmem>>, vector<16x8xf32>
    %cst_23 = arith.constant dense<0.000000e+00> : vector<8x8xf32>
    %131 = tpu.matmul %129, %130, %cst_23 {dimension_numbers = #tpu.dot_dimension_numbers<[1], [0], [0], [1], [0, 0, 1, 1], [], []>} : vector<8x16xf32>, vector<16x8xf32>, vector<8x8xf32> -> vector<8x8xf32>
    %132 = vector.extract_strided_slice %121 {offsets = [0, 64], sizes = [8, 16], strides = [1, 1]} : vector<8x256xf32> to vector<8x16xf32>
    %133 = vector.extract_strided_slice %121 {offsets = [0, 80], sizes = [8, 16], strides = [1, 1]} : vector<8x256xf32> to vector<8x16xf32>
    %134 = arith.addf %132, %133 : vector<8x16xf32>
    %c0_24 = arith.constant 0 : index
    %c0_25 = arith.constant 0 : index
    %135 = vector.load %arg8[%c0_24, %c0_25] : memref<16x8xf32, #tpu.memory_space<vmem>>, vector<16x8xf32>
    %cst_26 = arith.constant dense<0.000000e+00> : vector<8x8xf32>
    %136 = tpu.matmul %134, %135, %cst_26 {dimension_numbers = #tpu.dot_dimension_numbers<[1], [0], [0], [1], [0, 0, 1, 1], [], []>} : vector<8x16xf32>, vector<16x8xf32>, vector<8x8xf32> -> vector<8x8xf32>
    %137 = vector.extract_strided_slice %121 {offsets = [0, 96], sizes = [8, 16], strides = [1, 1]} : vector<8x256xf32> to vector<8x16xf32>
    %138 = vector.extract_strided_slice %121 {offsets = [0, 112], sizes = [8, 16], strides = [1, 1]} : vector<8x256xf32> to vector<8x16xf32>
    %139 = arith.addf %137, %138 : vector<8x16xf32>
    %c0_27 = arith.constant 0 : index
    %c0_28 = arith.constant 0 : index
    %140 = vector.load %arg8[%c0_27, %c0_28] : memref<16x8xf32, #tpu.memory_space<vmem>>, vector<16x8xf32>
    %cst_29 = arith.constant dense<0.000000e+00> : vector<8x8xf32>
    %141 = tpu.matmul %139, %140, %cst_29 {dimension_numbers = #tpu.dot_dimension_numbers<[1], [0], [0], [1], [0, 0, 1, 1], [], []>} : vector<8x16xf32>, vector<16x8xf32>, vector<8x8xf32> -> vector<8x8xf32>
    %142 = vector.extract_strided_slice %121 {offsets = [0, 128], sizes = [8, 16], strides = [1, 1]} : vector<8x256xf32> to vector<8x16xf32>
    %143 = vector.extract_strided_slice %121 {offsets = [0, 144], sizes = [8, 16], strides = [1, 1]} : vector<8x256xf32> to vector<8x16xf32>
    %144 = arith.addf %142, %143 : vector<8x16xf32>
    %c0_30 = arith.constant 0 : index
    %c0_31 = arith.constant 0 : index
    %145 = vector.load %arg8[%c0_30, %c0_31] : memref<16x8xf32, #tpu.memory_space<vmem>>, vector<16x8xf32>
    %cst_32 = arith.constant dense<0.000000e+00> : vector<8x8xf32>
    %146 = tpu.matmul %144, %145, %cst_32 {dimension_numbers = #tpu.dot_dimension_numbers<[1], [0], [0], [1], [0, 0, 1, 1], [], []>} : vector<8x16xf32>, vector<16x8xf32>, vector<8x8xf32> -> vector<8x8xf32>
    %147 = vector.extract_strided_slice %121 {offsets = [0, 160], sizes = [8, 16], strides = [1, 1]} : vector<8x256xf32> to vector<8x16xf32>
    %148 = vector.extract_strided_slice %121 {offsets = [0, 176], sizes = [8, 16], strides = [1, 1]} : vector<8x256xf32> to vector<8x16xf32>
    %149 = arith.addf %147, %148 : vector<8x16xf32>
    %c0_33 = arith.constant 0 : index
    %c0_34 = arith.constant 0 : index
    %150 = vector.load %arg8[%c0_33, %c0_34] : memref<16x8xf32, #tpu.memory_space<vmem>>, vector<16x8xf32>
    %cst_35 = arith.constant dense<0.000000e+00> : vector<8x8xf32>
    %151 = tpu.matmul %149, %150, %cst_35 {dimension_numbers = #tpu.dot_dimension_numbers<[1], [0], [0], [1], [0, 0, 1, 1], [], []>} : vector<8x16xf32>, vector<16x8xf32>, vector<8x8xf32> -> vector<8x8xf32>
    %152 = vector.extract_strided_slice %121 {offsets = [0, 192], sizes = [8, 16], strides = [1, 1]} : vector<8x256xf32> to vector<8x16xf32>
    %153 = vector.extract_strided_slice %121 {offsets = [0, 208], sizes = [8, 16], strides = [1, 1]} : vector<8x256xf32> to vector<8x16xf32>
    %154 = arith.addf %152, %153 : vector<8x16xf32>
    %c0_36 = arith.constant 0 : index
    %c0_37 = arith.constant 0 : index
    %155 = vector.load %arg8[%c0_36, %c0_37] : memref<16x8xf32, #tpu.memory_space<vmem>>, vector<16x8xf32>
    %cst_38 = arith.constant dense<0.000000e+00> : vector<8x8xf32>
    %156 = tpu.matmul %154, %155, %cst_38 {dimension_numbers = #tpu.dot_dimension_numbers<[1], [0], [0], [1], [0, 0, 1, 1], [], []>} : vector<8x16xf32>, vector<16x8xf32>, vector<8x8xf32> -> vector<8x8xf32>
    %157 = vector.extract_strided_slice %121 {offsets = [0, 224], sizes = [8, 16], strides = [1, 1]} : vector<8x256xf32> to vector<8x16xf32>
    %158 = vector.extract_strided_slice %121 {offsets = [0, 240], sizes = [8, 16], strides = [1, 1]} : vector<8x256xf32> to vector<8x16xf32>
    %159 = arith.addf %157, %158 : vector<8x16xf32>
    %c0_39 = arith.constant 0 : index
    %c0_40 = arith.constant 0 : index
    %160 = vector.load %arg8[%c0_39, %c0_40] : memref<16x8xf32, #tpu.memory_space<vmem>>, vector<16x8xf32>
    %cst_41 = arith.constant dense<0.000000e+00> : vector<8x8xf32>
    %161 = tpu.matmul %159, %160, %cst_41 {dimension_numbers = #tpu.dot_dimension_numbers<[1], [0], [0], [1], [0, 0, 1, 1], [], []>} : vector<8x16xf32>, vector<16x8xf32>, vector<8x8xf32> -> vector<8x8xf32>
    %162 = tpu.concatenate %126, %131, %136, %141, %146, %151, %156, %161 in 1 : vector<8x8xf32>, vector<8x8xf32>, vector<8x8xf32>, vector<8x8xf32>, vector<8x8xf32>, vector<8x8xf32>, vector<8x8xf32>, vector<8x8xf32> -> vector<8x64xf32>
    %163 = arith.negf %162 : vector<8x64xf32>
    %164 = math.exp %163 : vector<8x64xf32>
    %cst_42 = arith.constant 1.000000e+00 : f32
    %165 = vector.broadcast %cst_42 : f32 to vector<8x64xf32>
    %166 = arith.addf %165, %164 : vector<8x64xf32>
    %167 = arith.divf %165, %166 : vector<8x64xf32>
    %168 = arith.mulf %162, %167 : vector<8x64xf32>
    %cst_43 = arith.constant 0.909090936 : f32
    %169 = vector.broadcast %cst_43 : f32 to vector<8x64xf32>
    %170 = arith.mulf %168, %169 : vector<8x64xf32>
    %c0_44 = arith.constant 0 : index
    %c0_45 = arith.constant 0 : index
    %c0_46 = arith.constant 0 : index
    %171 = vector.load %arg9[%c0_44, %c0_45, %c0_46] : memref<1x8x64xf32, #tpu.memory_space<vmem>>, vector<1x8x64xf32>
    %172 = vector.shape_cast %171 : vector<1x8x64xf32> to vector<8x64xf32>
    %173 = vector.shape_cast %170 : vector<8x64xf32> to vector<1x8x64xf32>
    tpu.vector_store %arg9[%c0_44, %c0_45, %c0_46], %173 {strides = array<i32>} : memref<1x8x64xf32, #tpu.memory_space<vmem>>, vector<1x8x64xf32>,
    return
  }
  func.func @transform_0(%arg0: i32) -> (i32, i32, i32) {
    %c0_i32 = arith.constant 0 : i32
    %c0_i32_0 = arith.constant 0 : i32
    %c0_i32_1 = arith.constant 0 : i32
    return %arg0, %c0_i32, %c0_i32_0 : i32, i32, i32
  }
  func.func @transform_1(%arg0: i32) -> (i32, i32) {
    %c0_i32 = arith.constant 0 : i32
    %c0_i32_0 = arith.constant 0 : i32
    %c0_i32_1 = arith.constant 0 : i32
    return %c0_i32, %c0_i32_0 : i32, i32
  }
  func.func @transform_2(%arg0: i32) -> (i32, i32) {
    %c0_i32 = arith.constant 0 : i32
    %c0_i32_0 = arith.constant 0 : i32
    %c0_i32_1 = arith.constant 0 : i32
    return %c0_i32, %c0_i32_0 : i32, i32
  }
  func.func @transform_3(%arg0: i32) -> (i32, i32) {
    %c0_i32 = arith.constant 0 : i32
    %c0_i32_0 = arith.constant 0 : i32
    %c0_i32_1 = arith.constant 0 : i32
    return %c0_i32, %c0_i32_0 : i32, i32
  }
  func.func @transform_4(%arg0: i32) -> (i32, i32) {
    %c0_i32 = arith.constant 0 : i32
    %c0_i32_0 = arith.constant 0 : i32
    %c0_i32_1 = arith.constant 0 : i32
    return %c0_i32, %c0_i32_0 : i32, i32
  }
  func.func @transform_5(%arg0: i32) -> (i32, i32) {
    %c0_i32 = arith.constant 0 : i32
    %c0_i32_0 = arith.constant 0 : i32
    %c0_i32_1 = arith.constant 0 : i32
    return %c0_i32, %c0_i32_0 : i32, i32
  }
  func.func @transform_6(%arg0: i32) -> (i32, i32) {
    %c0_i32 = arith.constant 0 : i32
    %c0_i32_0 = arith.constant 0 : i32
    %c0_i32_1 = arith.constant 0 : i32
    return %c0_i32, %c0_i32_0 : i32, i32
  }
  func.func @transform_7(%arg0: i32) -> (i32, i32) {
    %c0_i32 = arith.constant 0 : i32
    %c0_i32_0 = arith.constant 0 : i32
    %c0_i32_1 = arith.constant 0 : i32
    return %c0_i32, %c0_i32_0 : i32, i32
  }
  func.func @transform_8(%arg0: i32) -> (i32, i32, i32) {
    %c0_i32 = arith.constant 0 : i32
    %c0_i32_0 = arith.constant 0 : i32
    %c0_i32_1 = arith.constant 0 : i32
    return %arg0, %c0_i32, %c0_i32_0 : i32, i32, i32
  }
}

</mosaic_0001>

<bundles_post_ra>
// kernel: tpu_custom_call.1
= control target key start
LH: loop header
LB: loop body
LE: loop exit
PB: predicated region body
PF: predicated region fallthrough
CT: control target
= control target key end

     0   :  { %13 = vsyncpa [#allocation3], 0  ;;  %s2430_s0 = inlined_call_operand.vmem [shape: f32[2,4,256], index: 0, kind: input, shape index: {}]   ;;  %s2431_s1 = inlined_call_operand.vmem [shape: f32[9,256], index: 1, kind: input, shape index: {}]   ;;  %s2432_s2 = inlined_call_operand.hbm [shape: f32[8,36], index: 2, kind: input, shape index: {}]   ;;  %s2433_s3 = inlined_call_operand.vmem [shape: f32[8,1], index: 3, kind: input, shape index: {}]   ;;  %s2434_s4 = inlined_call_operand.vmem [shape: f32[8,72], index: 4, kind: input, shape index: {}]   ;;  %s2435_s5 = inlined_call_operand.vmem [shape: f32[8,1], index: 5, kind: input, shape index: {}]   ;;  %s2436_s6 = inlined_call_operand.vmem [shape: f32[8,4], index: 6, kind: input, shape index: {}]   ;;  %s2437_s7 = inlined_call_operand.vmem [shape: f32[16,8], index: 7, kind: input, shape index: {}]   ;;  %s2438_s8 = inlined_call_operand.hbm [shape: f32[2,8,64], index: 8, kind: output, shape index: {}]  }
   0x1   :  { %14 = vsyncpa [#allocation4], 0 }
   0x2   :  { %16 = vsyncpa [#allocation4 + $0x1], 0  ;;  %s2027_s27 = smov 0   ;;  %s2029_s28 = smov 0  }
   0x3   :  { %s2031_s29 = smov 0   ;;  %s2033_s30 = smov 0  }
   0x4 LB: > { %s2048_s9 = sadd.s32 4294967295, %s1958_s30   ;;  %s1614_s10 = sadd.s32 4294967294, %s1958_s30   ;;  %s1958_s30 = sphi %s2033_s30, %s2457_s30   ;;  %s1954_s29 = sphi %s2031_s29, %s2456_s29   ;;  %s1950_s28 = sphi %s2029_s28, %s2455_s28   ;;  %s1946_s27 = sphi %s2027_s27, %s2454_s27  }
   0x5   : > { %s2052_s11 = sadd.s32 1, %s1958_s30   ;;  %s202_s12 = sadd.s32 1, %s1954_s29 }
   0x6   : > { %s199_s13 = ssub.s32 %s1958_s30, %s2052_s11  ;;  %p212_p0 = scmp.ne.s32.totalorder %s1954_s29, %s1950_s28 }
   0x7   : > { %p200_p1 = scmp.eq.s32.totalorder %s199_s13, 0  ;;  %p213_p2 = scmp.eq.s32.totalorder %s2048_s9, 1 }
   0x8   : > { %p218_p3 = scmp.ne.s32.totalorder %s1950_s28, %s1946_s27  ;;  %p219_p4 = scmp.eq.s32.totalorder %s1614_s10, 1 }
   0x9   : > { %s2063_s14 = scalar_select %p200_p1, %s1954_s29, %s202_s12  }
   0xa   : > { %p2065_p5 = por %p213_p2, %p212_p0  ;;  %p2069_p6 = por %p219_p4, %p218_p3 }
   0xb   : > { %p1615_p7 = scmp.ge.s32.totalorder %s1958_s30, 1  ;;  %p226_p8 = scmp.lt.s32.totalorder %s1958_s30, 3 }
   0xc   : > { %s2444_s15 = scalar_select %p2065_p5, 1, 0 }
   0xd   : > { %s2445_s16 = scalar_select %p2069_p6, 1, 0 }
   0xe   : > { %p2439_p9 = scmp.eq.s32.totalorder %s2048_s9, 0  ;;  %p2076_p10 = pnand %p1615_p7, %p226_p8 }
   0xf   : > { %s1960_s18 = smov [#allocation2]   ;;  %s1864_s23 = scalar_lea.hbm %s2432_s2, 128 }
  0x10   : > { %s2446_s17 = scalar_select %p2076_p10, 1, 0 }
  0x11   : > { %s242_s19 = sshll.u32 %s1960_s18, 4  ;;  %p1786_p11 = pneg %p2076_p10  ;;  %s243_s19 = int_to_ptr.vmem [resolvable:$true] %s242_s19 }
  0x12   : > { %p1865_p13 = scmp.ne.s32.totalorder %s2432_s2, %s1864_s23  ;;  %p1871_p3 = scmp.lt.u32.totalorder %s1864_s23, %s2432_s2 }
  0x13   : > { %p2084_p12 = pnand %p2439_p9, %p1786_p11 }
  0x15   : > { %p1866_p0 = pneg %p2084_p12 }
  0x17   : > { %p1867_p1 = pnand %p1866_p0, %p1865_p13 }
  0x19   : > { %p1868_p2 = pneg %p1867_p1 }
  0x1b   : > { %p1873_p4 = pnand %p1871_p3, %p1868_p2 }
  0x1d   : > { %1876 = shalt.err (!%p1873_p4)
}
  0x1e   : > { %s1877_s12 = scalar_lea.vmem %s243_s19, 128  ;;  %p1885_p9 = scmp.lt.s32.totalorder %s243_s19, %s243_s19 }
  0x1f   : > { %p1878_p7 = scmp.ne.s32.totalorder %s243_s19, %s1877_s12  ;;  %p1886_p6 = scmp.lt.s32.totalorder %s1877_s12, %s1877_s12 }
  0x21   : > { %p1880_p8 = pnand %p1878_p7, %p1866_p0  ;;  %p1887_p5 = por %p1886_p6, %p1885_p9 }
  0x23   : > { %p1881_p11 = pneg %p1880_p8 }
  0x25   : > { %p1888_p10 = pnand %p1887_p5, %p1881_p11 }
  0x27   : > { %1891 = shalt.err (!%p1888_p10)
}
  0x28   : > { %1789 = dma.hbm_to_vmem [thread:$0]  (!%p2084_p12), %s2432_s2, 128, %s243_s19, [#allocation3]  }
  0x29   : > { %p2448_p13 = scmp.ne.s32.totalorder %s2446_s17, 0 }
  0x2a   : > { %p2449_p1 = scmp.eq.s32.totalorder (!%p2448_p13), %s2048_s9, 0 }
  0x2b   : > { %278 = sbr.rel (%p2448_p13) target bundleno = 1449 (0x5a9), region = 52 }
  0x32   : > { %1937 = dma.done.wait (%p2449_p1), [#allocation3], 128   ;;  %p2450_p0 = pmov %p2449_p1 }
  0x33   : > { %p312_p6 = scmp.lt.s32.totalorder %s2048_s9, 1  ;;  %s1961_s19 = smov 1   ;;  %v1967_v2 = vmov 0.0   ;;  %v1969_v3 = vmov 0   ;;  %v519_v4 = vld [vmem:[%s2433_s3] sm:$0xff]  ;;  %v335_v5 = vlaneseq  ;;  %v2169_v11 = vld [vmem:[%s2431_s1 + $0x8] sm:$0xff] }
  0x34   : > { %1939 = vsyncadd (%p2450_p0), [#allocation3], 4294967168  ;;  %s1962_s17 = smov 16   ;;  %s1963_s25 = smov 17   ;;  %599 = vmatprep.mubr.f32.mxu0 %v1967_v2  ;;  %787 = vmatprep.mubr.f32.mxu1 %v1967_v2  ;;  %v2164_v10 = vld [vmem:[%s2431_s1] sm:$0xff]  ;;  %vm350_vm0 = vcmask 130048  }
  0x35   : > { %s313_s21 = scalar_select %p312_p6, %s2048_s9, 1  ;;  %1850 = vset.pattern.permute.xlu0 %v1969_v3  ;;  %v2158_v6 = vshrl.u32 %v335_v5, 7  ;;  %vm390_vm1 = vcmask 7168   ;;  %vm330_vm2 = vcmask 138240   ;;  %vm370_vm3 = vcmask 121856  }
  0x36   : > { %s1964_s26 = smov 15   ;;  %s1965_s10 = smov 127   ;;  %vm510_vm4 = vcmask 1043456   ;;  %vm409_vm5 = vcmask 1039360   ;;  %vm449_vm6 = vcmask 916480   ;;  %vm429_vm7 = vcmask 924672  }
  0x37   : > { %s1647_s22 = sshll.u32 %s313_s21, 3  ;;  %s2442_s12 = smov 112   ;;  %v357_v9 = vsub.s32 1, %v2158_v6  ;;  %v397_v12 = vsub.s32 3, %v2158_v6  ;;  %v337_v17 = vsub.s32 0, %v2158_v6  ;;  %v377_v22 = vsub.s32 2, %v2158_v6 }
  0x38   : > { %s316_s24 = scalar_lea.vmem %s2430_s0, %s1647_s22  ;;  %s1968_s13 = smov 113   ;;  %v417_v37 = vsub.s32 5, %v2158_v6  ;;  %v457_v42 = vsub.s32 7, %v2158_v6  ;;  %vm469_vm8 = vcmask 908288   ;;  %vm525_vm9 = vcmask 293888  }
  0x39   : > { %v2115_v0 = vld [vmem:[%s316_s24] sm:$0xff]  ;;  %s1970_s18 = smov 111   ;;  %v2173_v14 = vrot.slane %v2164_v10, %v357_v9  ;;  %v2176_v15 = vrot.slane %v2169_v11, %v357_v9  ;;  %v2182_v20 = vrot.slane %v2164_v10, %v397_v12  ;;  %v2185_v21 = vrot.slane %v2169_v11, %v397_v12  ;;  %s2451_s20 = smov 112  }
  0x3a   : > { %388 = vrot.lane.b32.xlu1 %v2115_v0, %s1961_s19  ;;  %348 = vrot.lane.b32.xlu0 %v2115_v0, %s1962_s17  ;;  %v2123_v1 = vcombine.high %v2115_v0, %v2115_v0  ;;  %v2191_v26 = vrot.slane %v2164_v10, %v337_v17  ;;  %v2194_v27 = vrot.slane %v2169_v11, %v337_v17  ;;  %vm719_vm10 = vcmask 588800   ;;  %s1973_s23 = smov 96   ;;  %s1975_s24 = smov 32  }
  0x3b   : > { %v2203_v35 = vrot.slane %v2164_v10, %v377_v22  ;;  %v2206_v36 = vrot.slane %v2169_v11, %v377_v22  ;;  %v2217_v51 = vrot.slane %v2164_v10, %v417_v37  ;;  %v2220_v52 = vrot.slane %v2169_v11, %v417_v37  ;;  %p2452_p9 = scmp.ne.s32.totalorder %s2444_s15, 0 }
  0x3c   : > { %v2229_v63 = vrot.slane %v2164_v10, %v457_v42  ;;  %v2232_v3 = vrot.slane %v2169_v11, %v457_v42  ;;  %vm795_vm11 = vcmask 31744   ;;  %vm1972_vm12 = vmmov 0  }
  0x3d   : > { %vm1506_vm13 = vcmask 64512   ;;  %vm1509_vm14 = vcmask 195584   ;;  %vm1511_vm15 = vcmask 261120  }
  0x3e   : > { %328 = vrot.lane.b32.xlu1 %v2115_v0, %s1963_s25  ;;  %345 = vrot.lane.b32.xlu0 %v2123_v1, %s1962_s17 }
  0x42   : > { %385 = vrot.lane.b32.xlu1 %v2123_v1, %s1961_s19  ;;  %325 = vrot.lane.b32.xlu0 %v2123_v1, %s1963_s25 }
  0x46   : > { %368 = vrot.lane.b32.xlu1 %v2115_v0, %s1964_s26  ;;  %365 = vrot.lane.b32.xlu0 %v2123_v1, %s1964_s26 }
  0x4a   : > { %407 = vrot.lane.b32.xlu1 %v2123_v1, %s1965_s10  ;;  %405 = vrot.lane.b32.xlu0 %v2115_v0, %s1965_s10 }
  0x4e   : > { %447 = vrot.lane.b32.xlu1 %v2123_v1, %s2442_s12  ;;  %445 = vrot.lane.b32.xlu0 %v2115_v0, %s2442_s12  ;;  %s1644_s12 = sshll.u32 %s2048_s9, 7  ;;  %s1981_s9 = smov [#allocation5]  }
  0x52   : > { %427 = vrot.lane.b32.xlu1 %v2123_v1, %s1968_s13  ;;  %425 = vrot.lane.b32.xlu0 %v2115_v0, %s1968_s13 }
  0x56   : > { %467 = vrot.lane.b32.xlu1 %v2123_v1, %s1970_s18  ;;  %465 = vrot.lane.b32.xlu0 %v2115_v0, %s1970_s18 }
  0x5a   : > { %522 = vperm.xlu0 %1850, %v519_v4   ;;  %v437_v4 = vsub.s32 6, %v2158_v6 }
  0x5c   : > { %v2245_v6 = vrot.slane %v2169_v11, %v437_v4 }
  0xac   : > { %v389_v7 = vpop.permute.xlu1 %388  ;;  %v349_v8 = vpop.permute.xlu0 %348 }
  0xb0   : > { %v329_v13 = vpop.permute.xlu1 %328  ;;  %v346_v16 = vpop.permute.xlu0 %345 }
  0xb1   : > { %v351_v18 = vsel %vm350_vm0, %v349_v8, %v346_v16  ;;  %v354_v19 = vsel %vm350_vm0, %v346_v16, %v349_v8 }
  0xb2   : > { %v363_v23 = vmul.f32 %v2173_v14, %v354_v19  ;;  %v364_v24 = vmul.f32 %v2176_v15, %v351_v18  ;;  %v2242_v18 = vrot.slane %v2164_v10, %v437_v4  ;;  %v2254_v10 = vld [vmem:[%s2431_s1 + $0x18] ss:$0 sm:$0xff] }
  0xb4   : > { %v386_v25 = vpop.permute.xlu1 %385  ;;  %v326_v28 = vpop.permute.xlu0 %325  ;;  %v487_v43 = vrot.slane %v363_v23, 4  ;;  %v488_v44 = vrot.slane %v364_v24, 4 }
  0xb5   : > { %v391_v29 = vsel %vm390_vm1, %v389_v7, %v386_v25  ;;  %v394_v30 = vsel %vm390_vm1, %v386_v25, %v389_v7  ;;  %v331_v31 = vsel %vm330_vm2, %v329_v13, %v326_v28  ;;  %v334_v32 = vsel %vm330_vm2, %v326_v28, %v329_v13 }
  0xb6   : > { %v403_v33 = vmul.f32 %v2182_v20, %v394_v30  ;;  %v404_v34 = vmul.f32 %v2185_v21, %v391_v29  ;;  %v343_v38 = vmul.f32 %v2191_v26, %v334_v32  ;;  %v344_v39 = vmul.f32 %v2194_v27, %v331_v31 }
  0xb8   : > { %v369_v40 = vpop.permute.xlu1 %368  ;;  %v366_v41 = vpop.permute.xlu0 %365  ;;  %v493_v47 = vrot.slane %v403_v33, 4  ;;  %v494_v48 = vrot.slane %v404_v34, 4  ;;  %v512_v55 = vsel %vm510_vm4, %v344_v39, %v488_v44  ;;  %v511_v57 = vsel %vm510_vm4, %v343_v38, %v487_v43 }
  0xb9   : > { %v371_v45 = vsel %vm370_vm3, %v369_v40, %v366_v41  ;;  %v374_v46 = vsel %vm370_vm3, %v366_v41, %v369_v40  ;;  %v2265_v41 = vld [vmem:[%s2431_s1 + $0x10] ss:$0 sm:$0xff] }
  0xba   : > { %v383_v49 = vmul.f32 %v2203_v35, %v374_v46  ;;  %v384_v50 = vmul.f32 %v2206_v36, %v371_v45 }
  0xbc   : > { %v408_v53 = vpop.permute.xlu1 %407  ;;  %v406_v54 = vpop.permute.xlu0 %405  ;;  %v514_v56 = vsel %vm510_vm4, %v384_v50, %v494_v48  ;;  %v513_v58 = vsel %vm510_vm4, %v383_v49, %v493_v47  ;;  %v322_v47 = vld [vmem:[#allocation2] sm:$0xff] }
  0xbd   : > { %v410_v59 = vsel %vm409_vm5, %v406_v54, %v408_v53  ;;  %v414_v60 = vsel %vm409_vm5, %v408_v53, %v406_v54  ;;  %v1728_v61 = vpack.c.bf16 %v514_v56, %v512_v55  ;;  %v1730_v62 = vpack.c.bf16 %v513_v58, %v511_v57 }
  0xbe   : > { %v423_v5 = vmul.f32 %v2217_v51, %v410_v59  ;;  %v424_v7 = vmul.f32 %v2220_v52, %v414_v60 }
  0xbf   : > { %1729 = vmatprep.subr.bf16.mxu0 %v1728_v61 }
  0xc0   : > { %v448_v8 = vpop.permute.xlu1 %447  ;;  %1731 = vmatpush1.bf16.msra.mxu0 %v1730_v62  ;;  %v446_v9 = vpop.permute.xlu0 %445  ;;  %v500_v19 = vrot.slane %v423_v5, 4  ;;  %v501_v22 = vrot.slane %v424_v7, 4 }
  0xc1   : > { %v450_v12 = vsel %vm449_vm6, %v446_v9, %v448_v8  ;;  %v454_v13 = vsel %vm449_vm6, %v448_v8, %v446_v9  ;;  %v713_v9 = vld [vmem:[%s2435_s5] sm:$0xff] }
  0xc2   : > { %v463_v16 = vmul.f32 %v2229_v63, %v450_v12  ;;  %v464_v17 = vmul.f32 %v2232_v3, %v454_v13  ;;  %v516_v33 = vsel %vm510_vm4, %v2123_v1, %v501_v22  ;;  %v515_v38 = vsel %vm510_vm4, %v2115_v0, %v500_v19 }
  0xc4   : > { %v428_v23 = vpop.permute.xlu1 %427  ;;  %v426_v24 = vpop.permute.xlu0 %425  ;;  %v506_v29 = vrot.slane %v463_v16, 4  ;;  %v507_v30 = vrot.slane %v464_v17, 4 }
  0xc5   : > { %v430_v25 = vsel %vm429_vm7, %v426_v24, %v428_v23  ;;  %v434_v28 = vsel %vm429_vm7, %v428_v23, %v426_v24 }
  0xc6   : > { %v443_v31 = vmul.f32 %v2242_v18, %v430_v25  ;;  %v444_v32 = vmul.f32 %v2245_v6, %v434_v28 }
  0xc8   : > { %v468_v11 = vpop.permute.xlu1 %467  ;;  %v518_v34 = vsel %vm510_vm4, %v444_v32, %v507_v30  ;;  %v466_v37 = vpop.permute.xlu0 %465  ;;  %v517_v39 = vsel %vm510_vm4, %v443_v31, %v506_v29 }
  0xc9   : > { %v1732_v40 = vpack.c.bf16 %v518_v34, %v516_v33  ;;  %v470_v42 = vsel %vm469_vm8, %v466_v37, %v468_v11  ;;  %v474_v43 = vsel %vm469_vm8, %v468_v11, %v466_v37  ;;  %v1734_v44 = vpack.c.bf16 %v517_v39, %v515_v38 }
  0xca   : > { %v484_v45 = vmul.f32 %v2254_v10, %v474_v43  ;;  %v483_v46 = vmul.f32 %v2265_v41, %v470_v42 }
  0xcb   : > { %1733 = vmatprep.subr.bf16.mxu0 %v1732_v40 }
  0xcc   : > { %1735 = vmatpush1.bf16.msra.mxu0 %v1734_v44 }
  0xcd   : > { %1625 = vmatprep.subr.msk.mxu0 %vm510_vm4, %v484_v45 }
  0xd0   : > { %1626 = vmatpush1.msk.msra.mxu0 %vm510_vm4, %v483_v46 }
  0xd1   : > { %1627 = vmatmul.mubr.msk.f32.vlgmr.msra.gmra.mrb[0].mxu0 %vm525_vm9, %v322_v47 }
  0xd2   : > { %1676 = vmatprep.mubr.msk.f32.mxu0 %vm1972_vm12, %v1967_v2 }
  0xd9   : > { %v523_v48 = vpop.permute.xlu0 %522 }
 0x1a4   : > { %v601_v49 = vpop.f32.mrb[0].mxu0 }
 0x1a5   : > { %v602_v50 = vadd.f32 %v601_v49, %v523_v48  ;;  %v603_v53 = vpop.f32.mrb[1].mxu0 }
 0x1a6   : > { %v604_v54 = vadd.f32 %v603_v53, %v523_v48 }
 0x1a7   : > { %v1628_v55 = vmul.f32 -1.442695, %v602_v50 }
 0x1a8   : > { %v1629_v56 = vmul.f32 -1.442695, %v604_v54 }
 0x1a9   : > { %1852 = vpow2.f32 %v1628_v55 }
 0x1aa   : > { %1854 = vpow2.f32 %v1629_v56 }
 0x1b3   : > { %v1853_v57 = vpop.eup %1852 }
 0x1b4   : > { %v1855_v58 = vpop.eup %1854  ;;  %v612_v59 = vadd.f32 1.0, %v1853_v57 }
 0x1b5   : > { %v613_v60 = vadd.f32 1.0, %v1855_v58 }
 0x1b6   : > { %1856 = vrcp.f32 %v612_v59 }
 0x1b7   : > { %1858 = vrcp.f32 %v613_v60 }
 0x1c0   : > { %v1857_v61 = vpop.eup %1856 }
 0x1c1   : > { %v1859_v62 = vpop.eup %1858  ;;  %v618_v4 = vmul.f32 %v1857_v61, %v602_v50 }
 0x1c2   : > { %v619_v7 = vmul.f32 %v1859_v62, %v604_v54 }
 0x1c3   : > { %v2273_v5 = vmul.f32 0.90909094, %v618_v4 }
 0x1c4   : > { %v621_v8 = vmul.f32 0.90909094, %v619_v7 }
 0x1c5   : > { %669 = vrot.lane.b32.xlu0 %v2273_v5, %s1965_s10  ;;  %628 = vrot.lane.b32.xlu1 %v2273_v5, %s1963_s25 }
 0x1c9   : > { %636 = vrot.lane.b32.xlu0 %v621_v8, %s1962_s17  ;;  %639 = vrot.lane.b32.xlu1 %v2273_v5, %s1962_s17 }
 0x1cd   : > { %647 = vrot.lane.b32.xlu0 %v621_v8, %s1964_s26  ;;  %650 = vrot.lane.b32.xlu1 %v2273_v5, %s1964_s26  ;;  %s1974_s26 = smov 64  }
 0x1d1   : > { %658 = vrot.lane.b32.xlu0 %v621_v8, %s1961_s19  ;;  %661 = vrot.lane.b32.xlu1 %v2273_v5, %s1961_s19  ;;  %s1977_s19 = smov 48  }
 0x1d5   : > { %680 = vrot.lane.b32.xlu0 %v2273_v5, %s1968_s13  ;;  %624 = vrot.lane.b32.xlu1 %v621_v8, %s1963_s25  ;;  %s1978_s25 = smov 24  }
 0x1d9   : > { %691 = vrot.lane.b32.xlu0 %v2273_v5, %s2451_s20  ;;  %671 = vrot.lane.b32.xlu1 %v621_v8, %s1965_s10  ;;  %s1979_s10 = smov 40  }
 0x1dd   : > { %702 = vrot.lane.b32.xlu0 %v2273_v5, %s1970_s18  ;;  %682 = vrot.lane.b32.xlu1 %v621_v8, %s1968_s13  ;;  %s1980_s13 = smov 56  }
 0x1e1   : > { %716 = vperm.xlu0 %1850, %v713_v9   ;;  %693 = vrot.lane.b32.xlu1 %v621_v8, %s2451_s20 }
 0x1e5   : > { %704 = vrot.lane.b32.xlu1 %v621_v8, %s1970_s18 }
 0x237   : > { %v670_v12 = vpop.permute.xlu0 %669  ;;  %v629_v13 = vpop.permute.xlu1 %628 }
 0x23b   : > { %v637_v16 = vpop.permute.xlu0 %636  ;;  %v640_v17 = vpop.permute.xlu1 %639 }
 0x23c   : > { %v644_v25 = vsel %vm350_vm0, %v637_v16, %v640_v17  ;;  %v641_v28 = vsel %vm350_vm0, %v640_v17, %v637_v16 }
 0x23d   : > { %v645_v30 = vmul.f32 %v644_v25, %v2173_v14  ;;  %v646_v34 = vmul.f32 %v641_v28, %v2176_v15 }
 0x23f   : > { %v648_v19 = vpop.permute.xlu0 %647  ;;  %v651_v22 = vpop.permute.xlu1 %650 }
 0x240   : > { %v652_v32 = vsel %vm370_vm3, %v651_v22, %v648_v19  ;;  %v655_v42 = vsel %vm370_vm3, %v648_v19, %v651_v22  ;;  %vm1517_vm3 = vcmask 457728  }
 0x241   : > { %v657_v14 = vmul.f32 %v652_v32, %v2206_v36 }
 0x243   : > { %v659_v23 = vpop.permute.xlu0 %658  ;;  %v662_v24 = vpop.permute.xlu1 %661 }
 0x244   : > { %v663_v29 = vsel %vm390_vm1, %v662_v24, %v659_v23  ;;  %v666_v37 = vsel %vm390_vm1, %v659_v23, %v662_v24  ;;  %vm1513_vm1 = vcmask 326656  }
 0x245   : > { %v668_v38 = vmul.f32 %v663_v29, %v2185_v21  ;;  %v667_v47 = vmul.f32 %v666_v37, %v2182_v20 }
 0x247   : > { %v625_v31 = vpop.permute.xlu1 %624  ;;  %v681_v43 = vpop.permute.xlu0 %680 }
 0x248   : > { %v630_v11 = vsel %vm330_vm2, %v629_v13, %v625_v31  ;;  %v633_v33 = vsel %vm330_vm2, %v625_v31, %v629_v13  ;;  %vm1515_vm2 = vcmask 392192  }
 0x249   : > { %v634_v39 = vmul.f32 %v633_v33, %v2191_v26  ;;  %v635_v40 = vmul.f32 %v630_v11, %v2194_v27  ;;  %v1740_v26 = vpack.c.bf16 %v668_v38, %v657_v14  ;;  %v656_v27 = vmul.f32 %v655_v42, %v2203_v35 }
 0x24b   : > { %v672_v44 = vpop.permute.xlu1 %671  ;;  %v1736_v45 = vpack.c.bf16 %v646_v34, %v635_v40  ;;  %v1738_v46 = vpack.c.bf16 %v645_v30, %v634_v39  ;;  %v1742_v50 = vpack.c.bf16 %v667_v47, %v656_v27  ;;  %v692_v53 = vpop.permute.xlu0 %691 }
 0x24c   : > { %v677_v15 = vsel %vm409_vm5, %v672_v44, %v670_v12  ;;  %v673_v48 = vsel %vm409_vm5, %v670_v12, %v672_v44 }
 0x24d   : > { %v679_v21 = vmul.f32 %v677_v15, %v2220_v52  ;;  %1737 = vmatprep.subr.bf16.mxu1 %v1736_v45  ;;  %v678_v36 = vmul.f32 %v673_v48, %v2217_v51 }
 0x24e   : > { %1739 = vmatpush1.bf16.msra.mxu1 %v1738_v46 }
 0x24f   : > { %1741 = vmatprep.subr.bf16.mxu1 %v1740_v26  ;;  %v683_v49 = vpop.permute.xlu1 %682  ;;  %v1744_v54 = vpack.c.bf16 %v679_v21, %v621_v8  ;;  %v1746_v35 = vpack.c.bf16 %v678_v36, %v2273_v5  ;;  %v703_v61 = vpop.permute.xlu0 %702 }
 0x250   : > { %v684_v20 = vsel %vm429_vm7, %v681_v43, %v683_v49  ;;  %v688_v55 = vsel %vm429_vm7, %v683_v49, %v681_v43 }
 0x251   : > { %v689_v58 = vmul.f32 %v684_v20, %v2242_v18  ;;  %v690_v51 = vmul.f32 %v688_v55, %v2245_v6  ;;  %v881_v6 = vld [vmem:[%s2437_s7] sm:$0xff] }
 0x252   : > { %1743 = vmatpush1.bf16.msra.mxu1 %v1742_v50 }
 0x253   : > { %1745 = vmatprep.subr.bf16.mxu1 %v1744_v54  ;;  %v694_v56 = vpop.permute.xlu1 %693 }
 0x254   : > { %v695_v52 = vsel %vm449_vm6, %v692_v53, %v694_v56  ;;  %v699_v57 = vsel %vm449_vm6, %v694_v56, %v692_v53 }
 0x255   : > { %v700_v59 = vmul.f32 %v695_v52, %v2229_v63  ;;  %v701_v60 = vmul.f32 %v699_v57, %v2232_v3  ;;  %v622_v63 = vld [vmem:[%s2434_s4] sm:$0xff] }
 0x256   : > { %1747 = vmatpush1.bf16.msra.mxu1 %v1746_v35  ;;  %v794_v3 = vld [vmem:[%s2436_s6] sm:$0xff] }
 0x257   : > { %v705_v62 = vpop.permute.xlu1 %704  ;;  %v1748_v4 = vpack.c.bf16 %v701_v60, %v690_v51  ;;  %v1750_v7 = vpack.c.bf16 %v700_v59, %v689_v58 }
 0x258   : > { %v710_v8 = vsel %vm469_vm8, %v705_v62, %v703_v61  ;;  %v706_v9 = vsel %vm469_vm8, %v703_v61, %v705_v62 }
 0x259   : > { %v712_v12 = vmul.f32 %v2254_v10, %v710_v8  ;;  %1749 = vmatprep.subr.bf16.mxu1 %v1748_v4  ;;  %v711_v18 = vmul.f32 %v2265_v41, %v706_v9  ;;  %v882_v10 = vld [vmem:[%s2437_s7 + $0x8] sm:$0xff] }
 0x25a   : > { %1751 = vmatpush1.bf16.msra.mxu1 %v1750_v7  ;;  %v1753_v41 = vpack.c.bf16 %v882_v10, %v881_v6 }
 0x25b   : > { %739 = vmatprep.subr.mxu1 %v712_v12 }
 0x25e   : > { %740 = vmatpush1.msra.mxu1 %v711_v18 }
 0x25f   : > { %1630 = vmatmul.mubr.msk.f32.vlgmr.msra.gmra.mrb[0].mxu1 %vm719_vm10, %v622_v63  ;;  %1631 = vmatprep.subr.msk.mxu1 %vm510_vm4, %v2123_v1  ;;  %v1971_v1 = vmov 0.0|0.0  }
 0x260   : > { %1632 = vmatpush1.msk.msra.mxu1 %vm510_vm4, %v2115_v0  ;;  %867 = vmatprep.mubr.f32.mxu1 %v1967_v2  ;;  %v717_v0 = vpop.permute.xlu0 %716 }
 0x261   : > { %1752 = vmatprep.subr.bf16.mxu0 %v1971_v1  ;;  %1764 = vmatprep.subr.bf16.mxu1 %v1971_v1 }
 0x262   : > { %1754 = vmatpush3.bf16.msra.mxu0 %v1753_v41 }
 0x263   : > { %1755 = vmatprep.subr.bf16.mxu0 %v1971_v1 }
 0x267   : > { %1633 = vmatmul.mubr.msk.f32.vlgmr.msra.gmra.mrb[0].mxu1 %vm795_vm11, %v794_v3 }
 0x268   : > { %1766 = vmatpush3.bf16.msra.mxu1 %v1753_v41  ;;  %1704 = vmatprep.mubr.msk.f32.mxu1 %vm1972_vm12, %v1967_v2 }
 0x269   : > { %1770 = vmatprep.subr.bf16.mxu1 %v1971_v1 }
 0x33a   : > { %v869_v5 = vpop.f32.mrb[0].mxu1 }
 0x33b   : > { %v1776_v13 = vadd.f32 %v869_v5, %v717_v0  ;;  %v871_v16 = vpop.f32.mrb[1].mxu1 }
 0x33c   : > { %v1777_v17 = vadd.f32 %v871_v16, %v717_v0 }
 0x33d   : > { %877 = vrot.lane.b32.xlu1 %v1776_v13, %s2451_s20 }
 0x33e   : > { %1179 = vrot.lane.b32.xlu0 %v1777_v17, %s2451_s20  ;;  %s1976_s20 = smov 8  }
 0x3af   : > { %v878_v19 = vpop.permute.xlu1 %877 }
 0x3b0   : > { %v880_v22 = vadd.f32 %v1776_v13, %v878_v19  ;;  %v1180_v23 = vpop.permute.xlu0 %1179 }
 0x3b1   : > { %v1182_v24 = vadd.f32 %v1777_v17, %v1180_v23 }
 0x3b2   : > { %956 = vrot.lane.b32.xlu1 %v880_v22, %s1973_s23  ;;  %1677 = vmatmul.mubr.msk.f32.vlgmr.msra.gmra.mrb[2].mxu0 %vm350_vm0, %v880_v22 }
 0x3b3   : > { %1030 = vrot.lane.b32.xlu0 %v880_v22, %s1974_s26  ;;  %1705 = vmatmul.mubr.msk.f32.vlgmr.msra.gmra.mrb[2].mxu1 %vm350_vm0, %v1182_v24 }
 0x3b4   : > { %1757 = vmatpush3.bf16.msra.mxu0 %v1753_v41  ;;  %1683 = vmatprep.mubr.msk.f32.mxu0 %vm1972_vm12, %v1967_v2 }
 0x3b5   : > { %1758 = vmatprep.subr.bf16.mxu0 %v1971_v1  ;;  %1772 = vmatpush3.bf16.msra.mxu1 %v1753_v41 }
 0x3b6   : > { %1104 = vrot.lane.b32.xlu1 %v880_v22, %s1975_s24  ;;  %1718 = vmatprep.mubr.msk.f32.mxu1 %vm1972_vm12, %v1967_v2 }
 0x3b7   : > { %1256 = vrot.lane.b32.xlu0 %v1182_v24, %s1973_s23 }
 0x3ba   : > { %1330 = vrot.lane.b32.xlu1 %v1182_v24, %s1974_s26 }
 0x3bb   : > { %1404 = vrot.lane.b32.xlu0 %v1182_v24, %s1975_s24 }
 0x424   : > { %v957_v25 = vpop.permute.xlu1 %956 }
 0x425   : > { %1684 = vmatmul.mubr.msk.f32.vlgmr.msra.gmra.mrb[4].mxu0 %vm350_vm0, %v957_v25  ;;  %v1031_v28 = vpop.permute.xlu0 %1030 }
 0x426   : > { %1760 = vmatpush3.bf16.msra.mxu0 %v1753_v41  ;;  %1690 = vmatprep.mubr.msk.f32.mxu0 %vm1972_vm12, %v1967_v2 }
 0x427   : > { %1761 = vmatprep.subr.bf16.mxu0 %v1971_v1 }
 0x428   : > { %v1105_v29 = vpop.permute.xlu1 %1104 }
 0x429   : > { %1691 = vmatmul.mubr.msk.f32.vlgmr.msra.gmra.mrb[6].mxu0 %vm350_vm0, %v1031_v28  ;;  %v1257_v31 = vpop.permute.xlu0 %1256 }
 0x42a   : > { %1763 = vmatpush3.bf16.msra.mxu0 %v1753_v41  ;;  %1697 = vmatprep.mubr.msk.f32.mxu0 %vm1972_vm12, %v1967_v2 }
 0x42b   : > { %1767 = vmatprep.subr.bf16.mxu0 %v1971_v1 }
 0x42c   : > { %v1331_v30 = vpop.permute.xlu1 %1330 }
 0x42d   : > { %1698 = vmatmul.mubr.msk.f32.vlgmr.msra.gmra.mrb[8].mxu0 %vm350_vm0, %v1105_v29  ;;  %1719 = vmatmul.mubr.msk.f32.vlgmr.msra.gmra.mrb[4].mxu1 %vm350_vm0, %v1331_v30  ;;  %v1405_v32 = vpop.permute.xlu0 %1404 }
 0x42e   : > { %1769 = vmatpush3.bf16.msra.mxu0 %v1753_v41  ;;  %1711 = vmatprep.mubr.msk.f32.mxu0 %vm1972_vm12, %v1967_v2 }
 0x42f   : > { %1773 = vmatprep.subr.bf16.mxu0 %v1971_v1 }
 0x431   : > { %1712 = vmatmul.mubr.msk.f32.vlgmr.msra.gmra.mrb[10].mxu0 %vm350_vm0, %v1257_v31 }
 0x432   : > { %1775 = vmatpush3.bf16.msra.mxu0 %v1753_v41  ;;  %1725 = vmatprep.mubr.msk.f32.mxu0 %vm1972_vm12, %v1967_v2 }
 0x435   : > { %1726 = vmatmul.mubr.msk.f32.vlgmr.msra.gmra.mrb[12].mxu0 %vm350_vm0, %v1405_v32 }
 0x485   : > { %v952_v11 = vpop.f32.mrb[2].mxu0 }
 0x486   : > { %v1678_v33 = vpop.f32.mrb[3].mxu0  ;;  %v1252_v34 = vpop.f32.mrb[2].mxu1 }
 0x487   : > { %1491 = vrot.lane.b32.xlu0 %v1252_v34, %s1975_s24  ;;  %v1706_v37 = vpop.f32.mrb[3].mxu1  ;;  %s2388_s24 = scalar_lea.hbm %s2438_s8, %s1644_s12 }
 0x4f8   : > { %v1026_v38 = vpop.f32.mrb[4].mxu0 }
 0x4f9   : > { %v1685_v39 = vpop.f32.mrb[5].mxu0  ;;  %1479 = vrot.lane.b32.xlu1 %v1026_v38, %s1976_s20  ;;  %v1492_v48 = vpop.permute.xlu0 %1491 }
 0x4fc   : > { %v1100_v40 = vpop.f32.mrb[6].mxu0 }
 0x4fd   : > { %1483 = vrot.lane.b32.xlu0 %v1100_v40, %s1962_s17  ;;  %v1692_v42 = vpop.f32.mrb[7].mxu0  ;;  %s309_s17 = sand.u32 1, %s1950_s28  }
 0x4fe   : > { %s1620_s18 = sshll.u32 %s309_s17, 3  ;;  %s1530_s20 = scalar_lea.sflag [#allocation4], %s309_s17 }
 0x4ff   : > { %s311_s21 = scalar_lea.vmem [#allocation5], %s1620_s18 }
 0x500   : > { %v1174_v14 = vpop.f32.mrb[8].mxu0  ;;  %v1400_v43 = vpop.f32.mrb[4].mxu1  ;;  %s1543_s22 = sshll.u32 %s311_s21, 4  ;;  %s2390_s22 = int_to_ptr.vmem [resolvable:$true] %s1543_s22 }
 0x501   : > { %v1720_v2 = vpop.f32.mrb[5].mxu1  ;;  %1499 = vrot.lane.b32.xlu0 %v1400_v43, %s1977_s19  ;;  %1487 = vrot.lane.b32.xlu1 %v1174_v14, %s1978_s25  ;;  %v1699_v44 = vpop.f32.mrb[9].mxu0  ;;  %s1892_s19 = scalar_lea.vmem %s2390_s22, 128  ;;  %s1896_s25 = sshll.u32 %s1981_s9, 4  ;;  %s1897_s25 = int_to_ptr.vmem [resolvable:$false] %s1896_s25 }
 0x502   : > { %p1893_p5 = scmp.ne.s32.totalorder %s2390_s22, %s1892_s19  ;;  %p1899_p2 = scmp.lt.s32.totalorder %s2390_s22, %s1897_s25 }
 0x504   : > { %v1326_v45 = vpop.f32.mrb[10].mxu0  ;;  %p1894_p10 = pnand %p1893_p5, %p2452_p9 }
 0x505   : > { %1495 = vrot.lane.b32.xlu1 %v1326_v45, %s1979_s10  ;;  %v1713_v46 = vpop.f32.mrb[11].mxu0  ;;  %s1898_s10 = scalar_lea.vmem %s1897_s25, 256 }
 0x506   : > { %p1895_p12 = pneg %p1894_p10  ;;  %p1900_p3 = scmp.lt.s32.totalorder %s1898_s10, %s1892_s19 }
 0x508   : > { %v1474_v47 = vpop.f32.mrb[12].mxu0  ;;  %p1901_p4 = por %p1900_p3, %p1899_p2 }
 0x509   : > { %1503 = vrot.lane.b32.xlu1 %v1474_v47, %s1980_s13  ;;  %v1727_v15 = vpop.f32.mrb[13].mxu0 }
 0x50a   : > { %p1902_p7 = pnand %p1901_p4, %p1895_p12 }
 0x56b   : > { %v1480_v21 = vpop.permute.xlu1 %1479 }
 0x56c   : > { %v1507_v27 = vsel %vm1506_vm13, %v952_v11, %v1480_v21 }
 0x56f   : > { %v1484_v26 = vpop.permute.xlu0 %1483 }
 0x570   : > { %v1508_v49 = vsel %vm350_vm0, %v1507_v27, %v1484_v26  ;;  %vm1527_vm0 = vcmask 523264  }
 0x573   : > { %v1488_v36 = vpop.permute.xlu1 %1487  ;;  %v1500_v55 = vpop.permute.xlu0 %1499 }
 0x574   : > { %v1510_v50 = vsel %vm1509_vm14, %v1508_v49, %v1488_v36 }
 0x575   : > { %v1512_v54 = vsel %vm1511_vm15, %v1510_v50, %v1492_v48 }
 0x577   : > { %v1496_v53 = vpop.permute.xlu1 %1495 }
 0x578   : > { %v1514_v20 = vsel %vm1513_vm1, %v1512_v54, %v1496_v53 }
 0x579   : > { %v1516_v52 = vsel %vm1515_vm2, %v1514_v20, %v1500_v55 }
 0x57b   : > { %v1504_v56 = vpop.permute.xlu1 %1503 }
 0x57c   : > { %v1518_v57 = vsel %vm1517_vm3, %v1516_v52, %v1504_v56 }
 0x57d   : > { %v1642_v35 = vmul.f32 -1.442695, %v1518_v57 }
 0x57f   : > { %1860 = vpow2.f32 %v1642_v35 }
 0x589   : > { %v1861_v58 = vpop.eup %1860 }
 0x58a   : > { %v1522_v51 = vadd.f32 1.0, %v1861_v58 }
 0x58c   : > { %1862 = vrcp.f32 %v1522_v51 }
 0x596   : > { %v1863_v59 = vpop.eup %1862 }
 0x597   : > { %v1525_v60 = vmul.f32 %v1863_v59, %v1518_v57 }
 0x599   : > { %v1526_v61 = vmul.f32 0.90909094, %v1525_v60 }
 0x59b   : > { %1528 = vst.msk [vmem:[%s311_s21] sm:$0xff] %vm1527_vm0, %v1526_v61 }
 0x59c   : > { %1905 = shalt.err (!%p1902_p7)
}
 0x59d   : > { %s1906_s13 = scalar_lea.hbm %s2388_s24, 128  ;;  %s1910_s12 = scalar_lea.hbm %s2438_s8, 256 }
 0x59e   : > { %p1907_p8 = scmp.ne.s32.totalorder %s2388_s24, %s1906_s13  ;;  %p1911_p1 = scmp.lt.u32.totalorder %s2388_s24, %s2438_s8 }
 0x59f   : > { %p1912_p0 = scmp.lt.u32.totalorder %s1910_s12, %s1906_s13  ;;  %p1914_p5 = scmp.lt.u32.totalorder %s1906_s13, %s2388_s24 }
 0x5a0   : > { %p1908_p11 = pnand %p1907_p8, %p2452_p9 }
 0x5a1   : > { %p1913_p6 = por %p1912_p0, %p1911_p1 }
 0x5a2   : > { %p1909_p13 = pneg %p1908_p11 }
 0x5a3   : > { %p1915_p10 = por %p1914_p5, %p1913_p6 }
 0x5a5   : > { %p1916_p12 = pnand %p1915_p10, %p1909_p13 }
 0x5a7   : > { %1919 = shalt.err (!%p1916_p12)
}
 0x5a8   : > { %1784 = dma.vmem_to_hbm [thread:$0]  (%p2452_p9), %s2390_s22, 128, %s2388_s24, %s1530_s20  }
 0x5a9 PF: > { %p1796_p2 = scmp.ge.s32.totalorder %s1958_s30, 2  ;;  %s1555_s26 = sand.u32 1, %s1946_s27  }
 0x5aa   : > { %p2453_p3 = scmp.ne.s32.totalorder %s2445_s16, 0  ;;  %s1556_s19 = scalar_lea.sflag [#allocation4], %s1555_s26 }
 0x5ac   : > { %p1791_p4 = pnand %p1796_p2, %p2453_p3 }
 0x5ae   : > { %1941 = dma.done.wait (!%p1791_p4), %s1556_s19, 128  }
 0x5af   : > { %1943 = vsyncadd (!%p1791_p4), %s1556_s19, 4294967168  ;;  %p19_p7 = scmp.ge.s32.totalorder %s2052_s11, 4   ;;  %s2454_s27 = smov %s1950_s28 }
 0x5b0   : > { %s2455_s28 = smov %s1954_s29  ;;  %s2456_s29 = smov %s2063_s14 }
 0x5b1   : > { %s2457_s30 = smov %s2052_s11  ;;  %21 = sbr.rel (!%p19_p7) target bundleno = 4 (0x4), region = 92 }
 0x5b8   :  { %1561 = vsyncpa [#allocation3], 1 }
 0x5b9   :  { %1563 = vsyncpa [#allocation3 + $0x1], 1 }
 0x5ba   :  { %1564 = vsyncpa [#allocation4], 1 }
 0x5bb   :  { %1566 = vsyncpa [#allocation4 + $0x1], 1 }

</bundles_post_ra>
